<compile_context>
chip_gen: v7x
topology: tpu7x:2x2x1
jax: 0.10.0
libtpu: 0.0.40
codegen_flags: <defaults>
</compile_context>

<pallas_src>
import math

import jax
import jax.numpy as jnp
import numpy as np
from jax import lax
from jax.experimental import pallas as pl
from jax.experimental.pallas import tpu as pltpu

# -------------------- config (small, consistent with the module) --------------------
B = 2          # batch
N = 8          # number of agents (sequence length)
D = 32         # input_dim (must be divisible by num_heads)
H = 4          # num_heads
HD = D // H    # head dim
EPS = 1e-5     # LayerNorm eps (PyTorch default)

# MXU operand dtype.  bf16 per perf review (native MXU input on v5e/v6e/v7x);
# switch to jnp.float32 for ~1e-4 agreement with the f32 reference.
MATMUL_DTYPE = jnp.bfloat16


def _layernorm(x, g, b):
    mu = jnp.mean(x, axis=-1, keepdims=True)
    var = jnp.mean((x - mu) ** 2, axis=-1, keepdims=True)
    return (x - mu) * lax.rsqrt(var + EPS) * g + b


# ------------------------------- Pallas kernel --------------------------------------
def rsa_kernel(x_ref, vecs_ref, bqkv_ref, b1_ref,
               wqkv_ref, wo_ref, w1_ref, w2_ref,
               hmask_ref, segones_ref,
               refined_ref):
    """One grid step = one batch of N agents (full RSA block forward)."""
    n, d = x_ref.shape                 # (N, D)
    hn = hmask_ref.shape[0]            # H * N
    heads = hn // n

    x = x_ref[...]                     # (N, D) f32

    # packed (1, D) vector params
    g1 = vecs_ref[0:1, :]
    be1 = vecs_ref[1:2, :]
    bo = vecs_ref[2:3, :]
    g2 = vecs_ref[3:4, :]
    be2 = vecs_ref[4:5, :]
    b2 = vecs_ref[5:6, :]

    # ---- LayerNorm 1 (f32 elementwise) ----
    n1 = _layernorm(x, g1, be1)

    # ---- Fused Q/K/V projection: (N, D) @ (D, 3D), bf16 operands, f32 accum ----
    # 1/sqrt(head_dim) is already folded into the Q columns of wqkv / bqkv.
    qkv = jnp.dot(n1.astype(MATMUL_DTYPE), wqkv_ref[...],
                  preferred_element_type=jnp.float32) + bqkv_ref[...]
    q = qkv[:, 0:d]                    # (N, D), pre-scaled
    k = qkv[:, d:2 * d]                # (N, D)
    v = qkv[:, 2 * d:3 * d]            # (N, D)

    # ---- Packed multi-head attention (heads stacked along sublanes) ----
    # Row h*N + j of km/vm holds K/V row j restricted (masked) to head h's
    # feature block.  broadcast + leading-dim reshape is layout-trivial.
    hm = hmask_ref[...]                                            # (HN, D) f32 const
    kt = jnp.broadcast_to(k[None, :, :], (heads, n, d)).reshape(hn, d)
    vt = jnp.broadcast_to(v[None, :, :], (heads, n, d)).reshape(hn, d)
    km = (kt * hm).astype(MATMUL_DTYPE)                            # (HN, D)
    vm = (vt * hm).astype(MATMUL_DTYPE)                            # (HN, D)

    # Scores for all heads in one matmul: s[i, h*N + j] = <q_i, k_j> | head h.
    s = lax.dot_general(q.astype(MATMUL_DTYPE), km, (((1,), (1,)), ((), ())),
                        preferred_element_type=jnp.float32)        # (N, HN)

    # Softmax per length-N head segment.  A shared per-row max is exact
    # (constant within each segment); the denominator is guarded so that a
    # fully-underflowed segment degrades to zeros instead of inf/NaN.
    # TODO(synk): a per-(row, segment) max would be fully robust to >80-logit
    # spread between heads of the same query row.
    m = jnp.max(s, axis=-1, keepdims=True)
    e = jnp.exp(s - m)                                             # f32, >= 0
    denom = jnp.dot(e.astype(MATMUL_DTYPE), segones_ref[...],
                    preferred_element_type=jnp.float32)            # per-segment sums
    p = e / jnp.maximum(denom, 1e-30)                              # exact f32 divide

    # P @ V (head-masked) lands each head in its own lane block of D.
    # TODO(synk): attention dropout skipped (inference / eval-mode semantics).
    o = jnp.dot(p.astype(MATMUL_DTYPE), vm,
                preferred_element_type=jnp.float32)                # (N, D)
    attn = jnp.dot(o.astype(MATMUL_DTYPE), wo_ref[...],
                   preferred_element_type=jnp.float32) + bo

    # ---- First residual ----
    r1 = x + attn

    # ---- LayerNorm 2 ----
    n2 = _layernorm(r1, g2, be2)

    # ---- FFN: D -> 4D -> ReLU -> D (dropouts identity in eval mode) ----
    h = jnp.dot(n2.astype(MATMUL_DTYPE), w1_ref[...],
                preferred_element_type=jnp.float32) + b1_ref[...]
    h = jnp.maximum(h, 0.0)
    ffn = jnp.dot(h.astype(MATMUL_DTYPE), w2_ref[...],
                  preferred_element_type=jnp.float32) + b2

    # ---- Second residual ----
    refined_ref[...] = r1 + ffn


# ------------------------------- wrapper ---------------------------------------------
def pack_params(params, num_heads, num_agents):
    """One-time parameter packing (hoisted out of the per-call hot path)."""
    d = params["wq"].shape[0]
    hd = d // num_heads
    scale = 1.0 / math.sqrt(hd)

    # Fold 1/sqrt(hd) into the Q projection; fuse QKV weights/biases.
    wqkv = jnp.concatenate([params["wq"] * scale, params["wk"], params["wv"]],
                           axis=1).astype(MATMUL_DTYPE)                     # (D, 3D)
    bqkv = jnp.concatenate([params["bq"] * scale, params["bk"], params["bv"]],
                           axis=1)                                          # (1, 3D) f32

    # Pack the small (1, D) vectors into one (8, D) array.
    vecs = jnp.concatenate(
        [params["g1"], params["be1"], params["bo"],
         params["g2"], params["be2"], params["b2"],
         jnp.zeros((2, d), jnp.float32)], axis=0)                            # (8, D)

    # Constant masks built host-side (not rebuilt per grid step).
    hn = num_heads * num_agents
    r = np.arange(hn)[:, None]
    c = np.arange(d)[None, :]
    head_mask = ((r // num_agents) == (c // hd)).astype(np.float32)          # (HN, D)
    rr = np.arange(hn)[:, None]
    cc = np.arange(hn)[None, :]
    seg_ones = ((rr // num_agents) == (cc // num_agents)).astype(np.float32)  # (HN, HN)

    return dict(
        vecs=vecs,
        bqkv=bqkv,
        b1=params["b1"],
        wqkv=wqkv,
        wo=params["wo"].astype(MATMUL_DTYPE),
        w1=params["w1"].astype(MATMUL_DTYPE),
        w2=params["w2"].astype(MATMUL_DTYPE),
        head_mask=jnp.asarray(head_mask, jnp.float32),
        seg_ones=jnp.asarray(seg_ones).astype(MATMUL_DTYPE),
    )


def rsa_block(x, packed):
    """x: (B, N, D) float32.  Returns (refined (B, N, D), z (B, D))."""
    bx, nx, dx = x.shape

    args = (x, packed["vecs"], packed["bqkv"], packed["b1"],
            packed["wqkv"], packed["wo"], packed["w1"], packed["w2"],
            packed["head_mask"], packed["seg_ones"])

    def const_spec(a):
        nd = a.ndim
        return pl.BlockSpec(a.shape, lambda b, _nd=nd: (0,) * _nd)

    in_specs = [pl.BlockSpec((None, nx, dx), lambda b: (b, 0, 0))]
    in_specs += [const_spec(a) for a in args[1:]]

    refined = pl.pallas_call(
        rsa_kernel,
        out_shape=jax.ShapeDtypeStruct((bx, nx, dx), jnp.float32),
        grid=(bx,),
        in_specs=in_specs,
        out_specs=pl.BlockSpec((None, nx, dx), lambda b: (b, 0, 0)),
        compiler_params=pltpu.CompilerParams(
            dimension_semantics=("parallel",)),        # megacore on v7x
    )(*args)

    # Global context pooling done in XLA (review: drop the narrow z store).
    z = jnp.mean(refined, axis=1)
    return refined, z


rsa_forward = jax.jit(rsa_block)


# --------------------------- pure-JAX reference (for checking) ----------------------
def rsa_reference(x, p, num_heads=H):
    bx, nx, dx = x.shape
    hd = dx // num_heads

    def ln(v, g, b):
        mu = jnp.mean(v, axis=-1, keepdims=True)
        var = jnp.mean((v - mu) ** 2, axis=-1, keepdims=True)
        return (v - mu) * lax.rsqrt(var + EPS) * g[0] + b[0]

    n1 = ln(x, p["g1"], p["be1"])
    q = n1 @ p["wq"] + p["bq"][0]
    k = n1 @ p["wk"] + p["bk"][0]
    v = n1 @ p["wv"] + p["bv"][0]
    qh = q.reshape(bx, nx, num_heads, hd).transpose(0, 2, 1, 3)
    kh = k.reshape(bx, nx, num_heads, hd).transpose(0, 2, 1, 3)
    vh = v.reshape(bx, nx, num_heads, hd).transpose(0, 2, 1, 3)
    s = jnp.einsum("bhnd,bhmd->bhnm", qh, kh) / math.sqrt(hd)
    pattn = jax.nn.softmax(s, axis=-1)
    o = jnp.einsum("bhnm,bhmd->bhnd", pattn, vh).transpose(0, 2, 1, 3).reshape(bx, nx, dx)
    attn = o @ p["wo"] + p["bo"][0]
    r1 = x + attn
    n2 = ln(r1, p["g2"], p["be2"])
    ffn = jnp.maximum(n2 @ p["w1"] + p["b1"][0], 0.0) @ p["w2"] + p["b2"][0]
    refined = r1 + ffn
    return refined, refined.mean(axis=1)


# ------------------------------------- main ------------------------------------------
if __name__ == "__main__":
    key = jax.random.PRNGKey(0)
    keys = jax.random.split(key, 16)

    def rnd(k, shape, scale):
        return jax.random.normal(k, shape, dtype=jnp.float32) * scale

    params = {
        # LayerNorm 1
        "g1": jnp.ones((1, D), jnp.float32),
        "be1": jnp.zeros((1, D), jnp.float32),
        # Attention in-projections (split of PyTorch's in_proj_weight/bias)
        "wq": rnd(keys[0], (D, D), 1.0 / math.sqrt(D)),
        "bq": rnd(keys[1], (1, D), 0.02),
        "wk": rnd(keys[2], (D, D), 1.0 / math.sqrt(D)),
        "bk": rnd(keys[3], (1, D), 0.02),
        "wv": rnd(keys[4], (D, D), 1.0 / math.sqrt(D)),
        "bv": rnd(keys[5], (1, D), 0.02),
        # Attention out-projection
        "wo": rnd(keys[6], (D, D), 1.0 / math.sqrt(D)),
        "bo": rnd(keys[7], (1, D), 0.02),
        # LayerNorm 2
        "g2": jnp.ones((1, D), jnp.float32),
        "be2": jnp.zeros((1, D), jnp.float32),
        # FFN D -> 4D -> D
        "w1": rnd(keys[8], (D, 4 * D), 1.0 / math.sqrt(D)),
        "b1": rnd(keys[9], (1, 4 * D), 0.02),
        "w2": rnd(keys[10], (4 * D, D), 1.0 / math.sqrt(4 * D)),
        "b2": rnd(keys[11], (1, D), 0.02),
    }

    x = jax.random.normal(keys[12], (B, N, D), dtype=jnp.float32)

    packed = pack_params(params, num_heads=H, num_agents=N)   # one-time packing
    refined, z = rsa_forward(x, packed)
    refined, z = jax.block_until_ready((refined, z))

    ref_refined, ref_z = rsa_reference(x, params)
    # Loose tolerance is the bf16-MXU-operand tradeoff requested in the perf
    # review (softmax amplifies bf16 score rounding).  With MATMUL_DTYPE set to
    # jnp.float32 the kernel matches the f32 reference to ~1e-4.
    np.testing.assert_allclose(np.asarray(refined), np.asarray(ref_refined),
                               rtol=5e-2, atol=1e-1)
    np.testing.assert_allclose(np.asarray(z), np.asarray(ref_z),
                               rtol=5e-2, atol=1e-1)

    assert refined.shape == (B, N, D) and z.shape == (B, D)
    print("KERNEL_OK")
</pallas_src>

<mosaic_0001>
module attributes {stable_mosaic.version = 11 : i64} {
  func.func @rsa_kernel(%arg0: i32, %arg1: memref<1x8x32xf32, #tpu.memory_space<vmem>>, %arg2: memref<8x32xf32, #tpu.memory_space<vmem>>, %arg3: memref<1x96xf32, #tpu.memory_space<vmem>>, %arg4: memref<1x128xf32, #tpu.memory_space<vmem>>, %arg5: memref<32x96xbf16, #tpu.memory_space<vmem>>, %arg6: memref<32x32xbf16, #tpu.memory_space<vmem>>, %arg7: memref<32x128xbf16, #tpu.memory_space<vmem>>, %arg8: memref<128x32xbf16, #tpu.memory_space<vmem>>, %arg9: memref<32x32xf32, #tpu.memory_space<vmem>>, %arg10: memref<32x32xbf16, #tpu.memory_space<vmem>>, %arg11: memref<1x8x32xf32, #tpu.memory_space<vmem>>) attributes {dimension_semantics = [#tpu.dimension_semantics<parallel>], iteration_bounds = array<i64: 2>, scalar_prefetch = 0 : i64, scratch_operands = 0 : i64, tpu.core_type = #tpu.core_type<tc>, window_params = [{transform_indices = @transform_0, window_bounds = array<i64: 1, 8, 32>}, {pipeline_mode = #tpu.pipeline_mode<synchronous>, transform_indices = @transform_1, window_bounds = array<i64: 8, 32>}, {pipeline_mode = #tpu.pipeline_mode<synchronous>, transform_indices = @transform_2, window_bounds = array<i64: 1, 96>}, {pipeline_mode = #tpu.pipeline_mode<synchronous>, transform_indices = @transform_3, window_bounds = array<i64: 1, 128>}, {pipeline_mode = #tpu.pipeline_mode<synchronous>, transform_indices = @transform_4, window_bounds = array<i64: 32, 96>}, {pipeline_mode = #tpu.pipeline_mode<synchronous>, transform_indices = @transform_5, window_bounds = array<i64: 32, 32>}, {pipeline_mode = #tpu.pipeline_mode<synchronous>, transform_indices = @transform_6, window_bounds = array<i64: 32, 128>}, {pipeline_mode = #tpu.pipeline_mode<synchronous>, transform_indices = @transform_7, window_bounds = array<i64: 128, 32>}, {pipeline_mode = #tpu.pipeline_mode<synchronous>, transform_indices = @transform_8, window_bounds = array<i64: 32, 32>}, {pipeline_mode = #tpu.pipeline_mode<synchronous>, transform_indices = @transform_9, window_bounds = array<i64: 32, 32>}, {transform_indices = @transform_10, window_bounds = array<i64: 1, 8, 32>}]} {
    %c0 = arith.constant 0 : index
    %c0_0 = arith.constant 0 : index
    %c0_1 = arith.constant 0 : index
    %0 = vector.load %arg1[%c0, %c0_0, %c0_1] : memref<1x8x32xf32, #tpu.memory_space<vmem>>, vector<1x8x32xf32>
    %1 = vector.shape_cast %0 : vector<1x8x32xf32> to vector<8x32xf32>
    %c0_2 = arith.constant 0 : index
    %c0_3 = arith.constant 0 : index
    %2 = vector.load %arg2[%c0_2, %c0_3] : memref<8x32xf32, #tpu.memory_space<vmem>>, vector<1x32xf32>
    %c1 = arith.constant 1 : index
    %c0_4 = arith.constant 0 : index
    %3 = vector.load %arg2[%c1, %c0_4] : memref<8x32xf32, #tpu.memory_space<vmem>>, vector<1x32xf32>
    %c2 = arith.constant 2 : index
    %c0_5 = arith.constant 0 : index
    %4 = vector.load %arg2[%c2, %c0_5] : memref<8x32xf32, #tpu.memory_space<vmem>>, vector<1x32xf32>
    %c3 = arith.constant 3 : index
    %c0_6 = arith.constant 0 : index
    %5 = vector.load %arg2[%c3, %c0_6] : memref<8x32xf32, #tpu.memory_space<vmem>>, vector<1x32xf32>
    %c4 = arith.constant 4 : index
    %c0_7 = arith.constant 0 : index
    %6 = vector.load %arg2[%c4, %c0_7] : memref<8x32xf32, #tpu.memory_space<vmem>>, vector<1x32xf32>
    %c5 = arith.constant 5 : index
    %c0_8 = arith.constant 0 : index
    %7 = vector.load %arg2[%c5, %c0_8] : memref<8x32xf32, #tpu.memory_space<vmem>>, vector<1x32xf32>
    %cst = arith.constant dense<0.000000e+00> : vector<8xf32>
    %8 = vector.multi_reduction <add>, %1, %cst [1] : vector<8x32xf32> to vector<8xf32>
    %9 = vector.shape_cast %8 : vector<8xf32> to vector<8x1xf32>
    %cst_9 = arith.constant 3.200000e+01 : f32
    %10 = vector.broadcast %cst_9 : f32 to vector<8x1xf32>
    %11 = arith.divf %9, %10 : vector<8x1xf32>
    %12 = vector.broadcast %11 : vector<8x1xf32> to vector<8x32xf32>
    %13 = arith.subf %1, %12 : vector<8x32xf32>
    %14 = arith.mulf %13, %13 : vector<8x32xf32>
    %cst_10 = arith.constant dense<0.000000e+00> : vector<8xf32>
    %15 = vector.multi_reduction <add>, %14, %cst_10 [1] : vector<8x32xf32> to vector<8xf32>
    %16 = vector.shape_cast %15 : vector<8xf32> to vector<8x1xf32>
    %cst_11 = arith.constant 3.200000e+01 : f32
    %17 = vector.broadcast %cst_11 : f32 to vector<8x1xf32>
    %18 = arith.divf %16, %17 : vector<8x1xf32>
    %19 = vector.broadcast %11 : vector<8x1xf32> to vector<8x32xf32>
    %20 = arith.subf %1, %19 : vector<8x32xf32>
    %cst_12 = arith.constant 9.99999974E-6 : f32
    %21 = vector.broadcast %cst_12 : f32 to vector<8x1xf32>
    %22 = arith.addf %18, %21 : vector<8x1xf32>
    %23 = math.rsqrt %22 : vector<8x1xf32>
    %24 = vector.broadcast %23 : vector<8x1xf32> to vector<8x32xf32>
    %25 = arith.mulf %20, %24 : vector<8x32xf32>
    %26 = vector.broadcast %2 : vector<1x32xf32> to vector<8x32xf32>
    %27 = arith.mulf %25, %26 : vector<8x32xf32>
    %28 = vector.broadcast %3 : vector<1x32xf32> to vector<8x32xf32>
    %29 = arith.addf %27, %28 : vector<8x32xf32>
    %30 = arith.truncf %29 : vector<8x32xf32> to vector<8x32xbf16>
    %c0_13 = arith.constant 0 : index
    %c0_14 = arith.constant 0 : index
    %31 = vector.load %arg5[%c0_13, %c0_14] : memref<32x96xbf16, #tpu.memory_space<vmem>>, vector<32x96xbf16>
    %cst_15 = arith.constant dense<0.000000e+00> : vector<8x96xf32>
    %32 = tpu.matmul %30, %31, %cst_15 {dimension_numbers = #tpu.dot_dimension_numbers<[1], [0], [0], [1], [0, 0, 1, 1], [], []>} : vector<8x32xbf16>, vector<32x96xbf16>, vector<8x96xf32> -> vector<8x96xf32>
    %c0_16 = arith.constant 0 : index
    %c0_17 = arith.constant 0 : index
    %33 = vector.load %arg3[%c0_16, %c0_17] : memref<1x96xf32, #tpu.memory_space<vmem>>, vector<1x96xf32>
    %34 = vector.broadcast %33 : vector<1x96xf32> to vector<8x96xf32>
    %35 = arith.addf %32, %34 : vector<8x96xf32>
    %36 = vector.extract_strided_slice %35 {offsets = [0, 0], sizes = [8, 32], strides = [1, 1]} : vector<8x96xf32> to vector<8x32xf32>
    %37 = vector.extract_strided_slice %35 {offsets = [0, 32], sizes = [8, 32], strides = [1, 1]} : vector<8x96xf32> to vector<8x32xf32>
    %38 = vector.extract_strided_slice %35 {offsets = [0, 64], sizes = [8, 32], strides = [1, 1]} : vector<8x96xf32> to vector<8x32xf32>
    %c0_18 = arith.constant 0 : index
    %c0_19 = arith.constant 0 : index
    %39 = vector.load %arg9[%c0_18, %c0_19] : memref<32x32xf32, #tpu.memory_space<vmem>>, vector<32x32xf32>
    %40 = vector.shape_cast %37 : vector<8x32xf32> to vector<1x8x32xf32>
    %41 = vector.shape_cast %40 : vector<1x8x32xf32> to vector<1x8x32xf32>
    %42 = vector.broadcast %41 : vector<1x8x32xf32> to vector<4x8x32xf32>
    %43 = vector.shape_cast %42 : vector<4x8x32xf32> to vector<32x32xf32>
    %44 = vector.shape_cast %38 : vector<8x32xf32> to vector<1x8x32xf32>
    %45 = vector.shape_cast %44 : vector<1x8x32xf32> to vector<1x8x32xf32>
    %46 = vector.broadcast %45 : vector<1x8x32xf32> to vector<4x8x32xf32>
    %47 = vector.shape_cast %46 : vector<4x8x32xf32> to vector<32x32xf32>
    %48 = arith.mulf %43, %39 : vector<32x32xf32>
    %49 = arith.truncf %48 : vector<32x32xf32> to vector<32x32xbf16>
    %50 = arith.mulf %47, %39 : vector<32x32xf32>
    %51 = arith.truncf %50 : vector<32x32xf32> to vector<32x32xbf16>
    %52 = arith.truncf %36 : vector<8x32xf32> to vector<8x32xbf16>
    %cst_20 = arith.constant dense<0.000000e+00> : vector<8x32xf32>
    %53 = tpu.matmul %52, %49, %cst_20 {dimension_numbers = #tpu.dot_dimension_numbers<[1], [1], [0], [0], [0, 0, 1, 0], [], []>} : vector<8x32xbf16>, vector<32x32xbf16>, vector<8x32xf32> -> vector<8x32xf32>
    %cst_21 = arith.constant dense<0xFF800000> : vector<8xf32>
    %54 = vector.multi_reduction <maximumf>, %53, %cst_21 [1] : vector<8x32xf32> to vector<8xf32>
    %55 = vector.shape_cast %54 : vector<8xf32> to vector<8x1xf32>
    %56 = vector.broadcast %55 : vector<8x1xf32> to vector<8x32xf32>
    %57 = arith.subf %53, %56 : vector<8x32xf32>
    %58 = math.exp %57 : vector<8x32xf32>
    %59 = arith.truncf %58 : vector<8x32xf32> to vector<8x32xbf16>
    %c0_22 = arith.constant 0 : index
    %c0_23 = arith.constant 0 : index
    %60 = vector.load %arg10[%c0_22, %c0_23] : memref<32x32xbf16, #tpu.memory_space<vmem>>, vector<32x32xbf16>
    %cst_24 = arith.constant dense<0.000000e+00> : vector<8x32xf32>
    %61 = tpu.matmul %59, %60, %cst_24 {dimension_numbers = #tpu.dot_dimension_numbers<[1], [0], [0], [1], [0, 0, 1, 1], [], []>} : vector<8x32xbf16>, vector<32x32xbf16>, vector<8x32xf32> -> vector<8x32xf32>
    %cst_25 = arith.constant 1.000000e-30 : f32
    %62 = vector.broadcast %cst_25 : f32 to vector<8x32xf32>
    %63 = arith.maximumf %61, %62 : vector<8x32xf32>
    %64 = arith.divf %58, %63 : vector<8x32xf32>
    %65 = arith.truncf %64 : vector<8x32xf32> to vector<8x32xbf16>
    %cst_26 = arith.constant dense<0.000000e+00> : vector<8x32xf32>
    %66 = tpu.matmul %65, %51, %cst_26 {dimension_numbers = #tpu.dot_dimension_numbers<[1], [0], [0], [1], [0, 0, 1, 1], [], []>} : vector<8x32xbf16>, vector<32x32xbf16>, vector<8x32xf32> -> vector<8x32xf32>
    %67 = arith.truncf %66 : vector<8x32xf32> to vector<8x32xbf16>
    %c0_27 = arith.constant 0 : index
    %c0_28 = arith.constant 0 : index
    %68 = vector.load %arg6[%c0_27, %c0_28] : memref<32x32xbf16, #tpu.memory_space<vmem>>, vector<32x32xbf16>
    %cst_29 = arith.constant dense<0.000000e+00> : vector<8x32xf32>
    %69 = tpu.matmul %67, %68, %cst_29 {dimension_numbers = #tpu.dot_dimension_numbers<[1], [0], [0], [1], [0, 0, 1, 1], [], []>} : vector<8x32xbf16>, vector<32x32xbf16>, vector<8x32xf32> -> vector<8x32xf32>
    %70 = vector.broadcast %4 : vector<1x32xf32> to vector<8x32xf32>
    %71 = arith.addf %69, %70 : vector<8x32xf32>
    %72 = arith.addf %1, %71 : vector<8x32xf32>
    %cst_30 = arith.constant dense<0.000000e+00> : vector<8xf32>
    %73 = vector.multi_reduction <add>, %72, %cst_30 [1] : vector<8x32xf32> to vector<8xf32>
    %74 = vector.shape_cast %73 : vector<8xf32> to vector<8x1xf32>
    %cst_31 = arith.constant 3.200000e+01 : f32
    %75 = vector.broadcast %cst_31 : f32 to vector<8x1xf32>
    %76 = arith.divf %74, %75 : vector<8x1xf32>
    %77 = vector.broadcast %76 : vector<8x1xf32> to vector<8x32xf32>
    %78 = arith.subf %72, %77 : vector<8x32xf32>
    %79 = arith.mulf %78, %78 : vector<8x32xf32>
    %cst_32 = arith.constant dense<0.000000e+00> : vector<8xf32>
    %80 = vector.multi_reduction <add>, %79, %cst_32 [1] : vector<8x32xf32> to vector<8xf32>
    %81 = vector.shape_cast %80 : vector<8xf32> to vector<8x1xf32>
    %cst_33 = arith.constant 3.200000e+01 : f32
    %82 = vector.broadcast %cst_33 : f32 to vector<8x1xf32>
    %83 = arith.divf %81, %82 : vector<8x1xf32>
    %84 = vector.broadcast %76 : vector<8x1xf32> to vector<8x32xf32>
    %85 = arith.subf %72, %84 : vector<8x32xf32>
    %cst_34 = arith.constant 9.99999974E-6 : f32
    %86 = vector.broadcast %cst_34 : f32 to vector<8x1xf32>
    %87 = arith.addf %83, %86 : vector<8x1xf32>
    %88 = math.rsqrt %87 : vector<8x1xf32>
    %89 = vector.broadcast %88 : vector<8x1xf32> to vector<8x32xf32>
    %90 = arith.mulf %85, %89 : vector<8x32xf32>
    %91 = vector.broadcast %5 : vector<1x32xf32> to vector<8x32xf32>
    %92 = arith.mulf %90, %91 : vector<8x32xf32>
    %93 = vector.broadcast %6 : vector<1x32xf32> to vector<8x32xf32>
    %94 = arith.addf %92, %93 : vector<8x32xf32>
    %95 = arith.truncf %94 : vector<8x32xf32> to vector<8x32xbf16>
    %c0_35 = arith.constant 0 : index
    %c0_36 = arith.constant 0 : index
    %96 = vector.load %arg7[%c0_35, %c0_36] : memref<32x128xbf16, #tpu.memory_space<vmem>>, vector<32x128xbf16>
    %cst_37 = arith.constant dense<0.000000e+00> : vector<8x128xf32>
    %97 = tpu.matmul %95, %96, %cst_37 {dimension_numbers = #tpu.dot_dimension_numbers<[1], [0], [0], [1], [0, 0, 1, 1], [], []>} : vector<8x32xbf16>, vector<32x128xbf16>, vector<8x128xf32> -> vector<8x128xf32>
    %c0_38 = arith.constant 0 : index
    %c0_39 = arith.constant 0 : index
    %98 = vector.load %arg4[%c0_38, %c0_39] : memref<1x128xf32, #tpu.memory_space<vmem>>, vector<1x128xf32>
    %99 = vector.broadcast %98 : vector<1x128xf32> to vector<8x128xf32>
    %100 = arith.addf %97, %99 : vector<8x128xf32>
    %cst_40 = arith.constant 0.000000e+00 : f32
    %101 = vector.broadcast %cst_40 : f32 to vector<8x128xf32>
    %102 = arith.maximumf %100, %101 : vector<8x128xf32>
    %103 = arith.truncf %102 : vector<8x128xf32> to vector<8x128xbf16>
    %c0_41 = arith.constant 0 : index
    %c0_42 = arith.constant 0 : index
    %104 = vector.load %arg8[%c0_41, %c0_42] : memref<128x32xbf16, #tpu.memory_space<vmem>>, vector<128x32xbf16>
    %cst_43 = arith.constant dense<0.000000e+00> : vector<8x32xf32>
    %105 = tpu.matmul %103, %104, %cst_43 {dimension_numbers = #tpu.dot_dimension_numbers<[1], [0], [0], [1], [0, 0, 1, 1], [], []>} : vector<8x128xbf16>, vector<128x32xbf16>, vector<8x32xf32> -> vector<8x32xf32>
    %106 = vector.broadcast %7 : vector<1x32xf32> to vector<8x32xf32>
    %107 = arith.addf %105, %106 : vector<8x32xf32>
    %108 = arith.addf %72, %107 : vector<8x32xf32>
    %c0_44 = arith.constant 0 : index
    %c0_45 = arith.constant 0 : index
    %c0_46 = arith.constant 0 : index
    %109 = vector.load %arg11[%c0_44, %c0_45, %c0_46] : memref<1x8x32xf32, #tpu.memory_space<vmem>>, vector<1x8x32xf32>
    %110 = vector.shape_cast %109 : vector<1x8x32xf32> to vector<8x32xf32>
    %111 = vector.shape_cast %108 : vector<8x32xf32> to vector<1x8x32xf32>
    tpu.vector_store %arg11[%c0_44, %c0_45, %c0_46], %111 {strides = array<i32>} : memref<1x8x32xf32, #tpu.memory_space<vmem>>, vector<1x8x32xf32>,
    return
  }
  func.func @transform_0(%arg0: i32) -> (i32, i32, i32) {
    %c0_i32 = arith.constant 0 : i32
    %c0_i32_0 = arith.constant 0 : i32
    %c0_i32_1 = arith.constant 0 : i32
    return %arg0, %c0_i32, %c0_i32_0 : i32, i32, i32
  }
  func.func @transform_1(%arg0: i32) -> (i32, i32) {
    %c0_i32 = arith.constant 0 : i32
    %c0_i32_0 = arith.constant 0 : i32
    %c0_i32_1 = arith.constant 0 : i32
    return %c0_i32, %c0_i32_0 : i32, i32
  }
  func.func @transform_2(%arg0: i32) -> (i32, i32) {
    %c0_i32 = arith.constant 0 : i32
    %c0_i32_0 = arith.constant 0 : i32
    %c0_i32_1 = arith.constant 0 : i32
    return %c0_i32, %c0_i32_0 : i32, i32
  }
  func.func @transform_3(%arg0: i32) -> (i32, i32) {
    %c0_i32 = arith.constant 0 : i32
    %c0_i32_0 = arith.constant 0 : i32
    %c0_i32_1 = arith.constant 0 : i32
    return %c0_i32, %c0_i32_0 : i32, i32
  }
  func.func @transform_4(%arg0: i32) -> (i32, i32) {
    %c0_i32 = arith.constant 0 : i32
    %c0_i32_0 = arith.constant 0 : i32
    %c0_i32_1 = arith.constant 0 : i32
    return %c0_i32, %c0_i32_0 : i32, i32
  }
  func.func @transform_5(%arg0: i32) -> (i32, i32) {
    %c0_i32 = arith.constant 0 : i32
    %c0_i32_0 = arith.constant 0 : i32
    %c0_i32_1 = arith.constant 0 : i32
    return %c0_i32, %c0_i32_0 : i32, i32
  }
  func.func @transform_6(%arg0: i32) -> (i32, i32) {
    %c0_i32 = arith.constant 0 : i32
    %c0_i32_0 = arith.constant 0 : i32
    %c0_i32_1 = arith.constant 0 : i32
    return %c0_i32, %c0_i32_0 : i32, i32
  }
  func.func @transform_7(%arg0: i32) -> (i32, i32) {
    %c0_i32 = arith.constant 0 : i32
    %c0_i32_0 = arith.constant 0 : i32
    %c0_i32_1 = arith.constant 0 : i32
    return %c0_i32, %c0_i32_0 : i32, i32
  }
  func.func @transform_8(%arg0: i32) -> (i32, i32) {
    %c0_i32 = arith.constant 0 : i32
    %c0_i32_0 = arith.constant 0 : i32
    %c0_i32_1 = arith.constant 0 : i32
    return %c0_i32, %c0_i32_0 : i32, i32
  }
  func.func @transform_9(%arg0: i32) -> (i32, i32) {
    %c0_i32 = arith.constant 0 : i32
    %c0_i32_0 = arith.constant 0 : i32
    %c0_i32_1 = arith.constant 0 : i32
    return %c0_i32, %c0_i32_0 : i32, i32
  }
  func.func @transform_10(%arg0: i32) -> (i32, i32, i32) {
    %c0_i32 = arith.constant 0 : i32
    %c0_i32_0 = arith.constant 0 : i32
    %c0_i32_1 = arith.constant 0 : i32
    return %arg0, %c0_i32, %c0_i32_0 : i32, i32, i32
  }
}

</mosaic_0001>

<bundles_post_ra>
// kernel: rsa_block.1
= control target key start
LH: loop header
LB: loop body
LE: loop exit
PB: predicated region body
PF: predicated region fallthrough
CT: control target
= control target key end

     0   :  { %15 = vsyncpa [#allocation3], 0  ;;  %s1618_s0 = inlined_call_operand.vmem [shape: f32[2,8,32], index: 0, kind: input, shape index: {}]   ;;  %s1619_s1 = inlined_call_operand.vmem [shape: f32[8,32], index: 1, kind: input, shape index: {}]   ;;  %s1620_s2 = inlined_call_operand.vmem [shape: f32[1,96], index: 2, kind: input, shape index: {}]   ;;  %s1621_s3 = inlined_call_operand.vmem [shape: f32[1,128], index: 3, kind: input, shape index: {}]   ;;  %s1622_s4 = inlined_call_operand.vmem [shape: bf16[32,96], index: 4, kind: input, shape index: {}]   ;;  %s1623_s5 = inlined_call_operand.vmem [shape: bf16[32,32], index: 5, kind: input, shape index: {}]   ;;  %s1624_s6 = inlined_call_operand.hbm [shape: bf16[32,128], index: 6, kind: input, shape index: {}]   ;;  %s1625_s7 = inlined_call_operand.vmem [shape: bf16[128,32], index: 7, kind: input, shape index: {}]   ;;  %s1626_s8 = inlined_call_operand.vmem [shape: f32[32,32], index: 8, kind: input, shape index: {}]   ;;  %s1627_s9 = inlined_call_operand.hbm [shape: bf16[32,32], index: 9, kind: input, shape index: {}]   ;;  %s1628_s10 = inlined_call_operand.vmem [shape: f32[2,8,32], index: 10, kind: output, shape index: {}]  }
   0x1   :  { %16 = vsyncpa [#allocation5], 0  ;;  %s1382_s13 = smov 0  }
   0x2 LB: > { %s1388_s14 = sadd.s32 4294967295, %s1316_s13   ;;  %p1050_p0 = scmp.ge.s32.totalorder %s1316_s13, 1  ;;  %s1316_s13 = sphi %s1382_s13, %s22_s13  }
   0x3   : > { %p268_p1 = scmp.lt.s32.totalorder %s1316_s13, 3  ;;  %s1318_s15 = smov [#allocation2]  }
   0x4   : > { %s295_s16 = sshll.u32 %s1318_s15, 4  ;;  %p1629_p3 = scmp.eq.s32.totalorder %s1388_s14, 0  ;;  %s296_s16 = int_to_ptr.vmem [resolvable:$true] %s295_s16 }
   0x5   : > { %p1392_p2 = pnand %p1050_p0, %p268_p1  ;;  %s1319_s18 = smov [#allocation4]  }
   0x6   : > { %s314_s19 = sshll.u32 %s1319_s18, 4  ;;  %s1246_s23 = scalar_lea.hbm %s1624_s6, 256  ;;  %s1405_s19 = int_to_ptr.vmem [resolvable:$true] %s314_s19 }
   0x7   : > { %s1631_s17 = scalar_select %p1392_p2, 1, 0 }
   0x8   : > { %p1194_p4 = pneg %p1392_p2  ;;  %p1247_p6 = scmp.ne.s32.totalorder %s1624_s6, %s1246_s23 }
   0x9   : > { %p1253_p10 = scmp.lt.u32.totalorder %s1246_s23, %s1624_s6 }
   0xa   : > { %p1401_p5 = pnand %p1629_p3, %p1194_p4 }
   0xc   : > { %p1248_p7 = pneg %p1401_p5 }
   0xe   : > { %p1249_p8 = pnand %p1248_p7, %p1247_p6 }
  0x10   : > { %p1250_p9 = pneg %p1249_p8 }
  0x12   : > { %p1255_p11 = pnand %p1253_p10, %p1250_p9 }
  0x14   : > { %1258 = shalt.err (!%p1255_p11)
}
  0x15   : > { %s1259_s28 = scalar_lea.vmem %s296_s16, 256  ;;  %p1267_p1 = scmp.lt.s32.totalorder %s296_s16, %s296_s16 }
  0x16   : > { %p1260_p12 = scmp.ne.s32.totalorder %s296_s16, %s1259_s28  ;;  %p1268_p4 = scmp.lt.s32.totalorder %s1259_s28, %s1259_s28 }
  0x18   : > { %p1262_p13 = pnand %p1260_p12, %p1248_p7  ;;  %p1269_p3 = por %p1268_p4, %p1267_p1 }
  0x1a   : > { %p1263_p0 = pneg %p1262_p13 }
  0x1c   : > { %p1270_p2 = pnand %p1269_p3, %p1263_p0 }
  0x1e   : > { %1273 = shalt.err (!%p1270_p2)
}
  0x1f   : > { %s1320_s29 = smov 64   ;;  %s1321_s30 = smov 4  }
  0x20   : > { %1197 = dma.hbm_to_vmem [thread:$0]  (!%p1401_p5), %s1624_s6, 256, %s296_s16, [#allocation3], %s1320_s29, %s1320_s29, %s1321_s30  }
  0x21   : > { %s1274_s21 = scalar_lea.hbm %s1627_s9, 256 }
  0x22   : > { %p1275_p6 = scmp.ne.s32.totalorder %s1627_s9, %s1274_s21  ;;  %p1281_p8 = scmp.lt.u32.totalorder %s1274_s21, %s1627_s9 }
  0x24   : > { %p1277_p2 = pnand %p1275_p6, %p1248_p7 }
  0x26   : > { %p1278_p3 = pneg %p1277_p2 }
  0x28   : > { %p1283_p9 = pnand %p1281_p8, %p1278_p3 }
  0x2a   : > { %1286 = shalt.err (!%p1283_p9)
}
  0x2b   : > { %s1287_s16 = scalar_lea.vmem %s1405_s19, 256  ;;  %p1295_p13 = scmp.lt.s32.totalorder %s1405_s19, %s1405_s19 }
  0x2c   : > { %p1288_p10 = scmp.ne.s32.totalorder %s1405_s19, %s1287_s16  ;;  %p1296_p0 = scmp.lt.s32.totalorder %s1287_s16, %s1287_s16 }
  0x2e   : > { %p1290_p11 = pnand %p1288_p10, %p1248_p7  ;;  %p1297_p1 = por %p1296_p0, %p1295_p13 }
  0x30   : > { %p1291_p12 = pneg %p1290_p11 }
  0x32   : > { %p1298_p4 = pnand %p1297_p1, %p1291_p12 }
  0x34   : > { %1301 = shalt.err (!%p1298_p4)
}
  0x35   : > { %1200 = dma.hbm_to_vmem [thread:$0]  (!%p1401_p5), %s1627_s9, 256, %s1405_s19, [#allocation5], %s1320_s29, %s1320_s29, %s1321_s30  }
  0x36   : > { %p1633_p6 = scmp.ne.s32.totalorder %s1631_s17, 0 }
  0x37   : > { %p1634_p2 = scmp.eq.s32.totalorder (!%p1633_p6), %s1388_s14, 0 }
  0x38   : > { %337 = sbr.rel (%p1633_p6) target bundleno = 2518 (0x9d6), region = 60 }
  0x3f   : > { %1307 = dma.done.wait (%p1634_p2), [#allocation3], 256   ;;  %p1635_p7 = pmov %p1634_p2 }
  0x40   : > { %p1636_p3 = pmov %p1634_p2 }
  0x41   : > { %1309 = vsyncadd (%p1635_p7), [#allocation3], 4294967040 }
  0x42   : > { %1311 = dma.done.wait (%p1636_p3), [#allocation5], 256   ;;  %p1637_p8 = pmov %p1634_p2 }
  0x43   : > { %p377_p9 = scmp.lt.s32.totalorder %s1388_s14, 1  ;;  %vm393_vm0 = vcmask 261120   ;;  %v1222_v7 = vld [vmem:[%s1622_s4] sm:$0xff]   ;;  %v1322_v8 = vmov 0.0   ;;  %vm1323_vm1 = vmmov 0   ;;  %v1223_v9 = vld [vmem:[%s1622_s4 + $0x8] sm:$0xff]  }
  0x44   : > { %1313 = vsyncadd (%p1637_p8), [#allocation5], 4294967040  ;;  %1118 = vmatprep.subr.bf16.mxu0 %v1322_v8  ;;  %1122 = vmatprep.mubr.msk.bf16.mxu0 %vm1323_vm1, %v1322_v8  ;;  %v487_v10 = vld [vmem:[%s1626_s8 + $0x10] sm:$0xff]  ;;  %v485_v11 = vld [vmem:[%s1626_s8] sm:$0xff]  ;;  %s1324_s23 = smov 32   ;;  %s1325_s16 = smov 64  }
  0x45   : > { %s1639_s14 = smov (!%p377_p9, %s1388_s14), 1  ;;  %1119 = vmatpush3.bf16.msra.mxu0 %v1222_v7  ;;  %1150 = vmatprep.subr.bf16.mxu1 %v1322_v8  ;;  %v486_v12 = vld [vmem:[%s1626_s8 + $0x8] sm:$0xff]  ;;  %v488_v13 = vld [vmem:[%s1626_s8 + $0x18] sm:$0xff]  ;;  %v1059_v18 = vld [vmem:[%s1619_s1] ss:$0 sm:$0xff]  ;;  %s1326_s12 = smov 96  }
  0x46   : > { %s1057_s17 = sshll.u32 %s1639_s14, 3  ;;  %1120 = vmatprep.subr.bf16.mxu0 %v1322_v8  ;;  %1154 = vmatprep.mubr.msk.bf16.mxu1 %vm1323_vm1, %v1322_v8  ;;  %v1060_v20 = vld [vmem:[%s1619_s1 + $0x1] ss:$0 sm:$0xff]  ;;  %v1061_v30 = vld [vmem:[%s1620_s2] ss:$0 sm:$0xff]  ;;  %v1224_v60 = vld [vmem:[#allocation4] sm:$0xff]  }
  0x47   : > { %s380_s28 = scalar_lea.vmem %s1618_s0, %s1057_s17  ;;  %493 = vrot.lane.b32.xlu1 %v485_v11, %s1324_s23  ;;  %v1225_v61 = vld [vmem:[#allocation4 + $0x8] sm:$0xff]   ;;  %s384_s11 = scalar_lea.vmem %s1628_s10, %s1057_s17 }
  0x48   : > { %v1474_v0 = vld [vmem:[%s380_s28] sm:$0xff] }
  0x49   : > { %v394_v1 = vsel %vm393_vm0, %v1474_v0, 0.0  ;;  %1121 = vmatpush3.bf16.msra.mxu0 %v1223_v9 }
  0x4a   : > { %395 = vadd.xlane.f32.xlu0 %v394_v1  ;;  %1126 = vmatprep.subr.bf16.mxu0 %v1322_v8 }
  0x4b   : > { %495 = vrot.lane.b32.xlu1 %v486_v12, %s1324_s23 }
  0x4f   : > { %499 = vrot.lane.b32.xlu1 %v488_v13, %s1324_s23 }
  0xb9   : > { %v494_v26 = vpop.permute.xlu1 %493 }
  0xbd   : > { %v496_v28 = vpop.permute.xlu1 %495 }
  0xc1   : > { %v500_v34 = vpop.permute.xlu1 %499 }
  0xd7   : > { %v396_v2 = vpop.xlane.xlu0 %395 }
  0xd8   : > { %v398_v3 = vmul.f32 0.03125, %v396_v2 }
  0xda   : > { %v399_v4 = vsub.f32 %v1474_v0, %v398_v3 }
  0xdc   : > { %v400_v5 = vmul.f32 %v399_v4, %v399_v4 }
  0xde   : > { %v401_v6 = vsel %vm393_vm0, %v400_v5, 0.0 }
  0xdf   : > { %402 = vadd.xlane.f32.xlu0 %v401_v6  ;;  %v1226_v6 = vld [vmem:[%s1623_s5] sm:$0xff]  }
  0xe0   : > { %1151 = vmatpush3.bf16.msra.mxu1 %v1226_v6 }
  0xe1   : > { %1152 = vmatprep.subr.bf16.mxu1 %v1322_v8 }
  0xf5   : > { %497 = vrot.lane.b32.xlu0 %v487_v10, %s1324_s23 }
  0xf9   : > { %511 = vrot.lane.b32.xlu0 %v485_v11, %s1325_s16 }
  0xfd   : > { %513 = vrot.lane.b32.xlu0 %v486_v12, %s1325_s16 }
 0x101   : > { %515 = vrot.lane.b32.xlu0 %v487_v10, %s1325_s16 }
 0x105   : > { %517 = vrot.lane.b32.xlu0 %v488_v13, %s1325_s16 }
 0x16c   : > { %v403_v14 = vpop.xlane.xlu0 %402 }
 0x16d   : > { %v404_v15 = vmul.f32 0.03125, %v403_v14 }
 0x16f   : > { %v405_v16 = vadd.f32 1e-05, %v404_v15 }
 0x170   : > { %v498_v24 = vpop.permute.xlu0 %497 }
 0x171   : > { %1238 = vrsqrt.f32 %v405_v16  ;;  %v1227_v16 = vld [vmem:[%s1623_s5 + $0x8] sm:$0xff]  }
 0x172   : > { %1153 = vmatpush3.bf16.msra.mxu1 %v1227_v16 }
 0x173   : > { %1166 = vmatprep.subr.bf16.mxu1 %v1322_v8 }
 0x174   : > { %v512_v25 = vpop.permute.xlu0 %511 }
 0x178   : > { %v514_v27 = vpop.permute.xlu0 %513 }
 0x17b   : > { %v1239_v17 = vpop.eup %1238 }
 0x17c   : > { %v407_v19 = vmul.f32 %v1239_v17, %v399_v4  ;;  %v516_v29 = vpop.permute.xlu0 %515 }
 0x17e   : > { %v412_v21 = vmul.f32 %v1059_v18, %v407_v19 }
 0x180   : > { %v417_v22 = vadd.f32 %v1060_v20, %v412_v21  ;;  %v518_v36 = vpop.permute.xlu0 %517 }
 0x182   : > { %v418_v23 = vpack.c.bf16 %v417_v22, %v417_v22  ;;  %v1070_v22 = vld [vmem:[%s1619_s1 + $0x2] ss:$0 sm:$0xff] }
 0x184   : > { %1123 = vmatmul.mubr.msk.bf16.vlgmr.msra.gmra.mrb[0].mxu0 %vm393_vm0, %v418_v23 }
 0x185   : > { %1130 = vmatprep.mubr.msk.bf16.mxu0 %vm1323_vm1, %v1322_v8 }
 0x257   : > { %v479_v31 = vpop.f32.mrb[0].mxu0 }
 0x258   : > { %v480_v32 = vadd.f32 %v1061_v30, %v479_v31  ;;  %v1124_v33 = vpop.f32.mrb[1].mxu0 }
 0x259   : > { %v482_v35 = vpop.f32.mrb[2].mxu0 }
 0x25a   : > { %v1125_v37 = vpop.f32.mrb[3].mxu0  ;;  %v505_v38 = vmul.f32 %v494_v26, %v480_v32  ;;  %v506_v39 = vmul.f32 %v496_v28, %v480_v32  ;;  %v523_v40 = vmul.f32 %v512_v25, %v480_v32  ;;  %v524_v41 = vmul.f32 %v514_v27, %v480_v32  ;;  %v1228_v35 = vld [vmem:[#allocation2] sm:$0xff]  }
 0x25b   : > { %v507_v42 = vmul.f32 %v498_v24, %v480_v32  ;;  %v508_v43 = vmul.f32 %v500_v34, %v480_v32  ;;  %v525_v44 = vmul.f32 %v516_v29, %v480_v32  ;;  %v526_v45 = vmul.f32 %v518_v36, %v480_v32  ;;  %v1229_v36 = vld [vmem:[#allocation2 + $0x8] sm:$0xff]  }
 0x25c   : > { %v509_v46 = vpack.c.bf16 %v506_v39, %v505_v38  ;;  %v527_v47 = vpack.c.bf16 %v524_v41, %v523_v40  ;;  %v529_v54 = vpack.c.bf16 %v480_v32, %v480_v32  ;;  %v1231_v37 = vld [vmem:[%s1625_s7 + $0x8] sm:$0xff]   ;;  %v1232_v38 = vld [vmem:[%s1625_s7 + $0x10] sm:$0xff]   ;;  %v1233_v39 = vld [vmem:[%s1625_s7 + $0x18] sm:$0xff]  }
 0x25d   : > { %v510_v48 = vpack.c.bf16 %v508_v43, %v507_v42  ;;  %v528_v49 = vpack.c.bf16 %v526_v45, %v525_v44  ;;  %v1234_v40 = vld [vmem:[%s1625_s7 + $0x20] sm:$0xff]   ;;  %v1235_v41 = vld [vmem:[%s1625_s7 + $0x28] sm:$0xff]  }
 0x25e   : > { %532 = vrot.lane.b32.xlu1 %v509_v46, %s1326_s12  ;;  %657 = vrot.lane.b32.xlu0 %v527_v47, %s1325_s16  ;;  %v1074_v46 = vld [vmem:[%s1619_s1 + $0x3] ss:$0 sm:$0xff] }
 0x262   : > { %534 = vrot.lane.b32.xlu1 %v510_v48, %s1326_s12  ;;  %659 = vrot.lane.b32.xlu0 %v528_v49, %s1325_s16  ;;  %v1075_v48 = vld [vmem:[%s1619_s1 + $0x4] ss:$0 sm:$0xff] }
 0x2d0   : > { %v533_v50 = vpop.permute.xlu1 %532  ;;  %v658_v3 = vpop.permute.xlu0 %657 }
 0x2d1   : > { %v540_v51 = vsel %vm393_vm0, %v533_v50, 0 }
 0x2d2   : > { %1127 = vmatpush3.bf16.xpose.msra.mxu0 %v540_v51 }
 0x2d3   : > { %1128 = vmatprep.subr.bf16.mxu0 %v1322_v8 }
 0x2d4   : > { %v535_v52 = vpop.permute.xlu1 %534  ;;  %v660_v5 = vpop.permute.xlu0 %659 }
 0x2d5   : > { %v543_v53 = vsel %vm393_vm0, %v535_v52, 0  ;;  %v1236_v52 = vld [vmem:[%s1625_s7 + $0x30] sm:$0xff]  }
 0x2da   : > { %1129 = vmatpush3.bf16.xpose.msra.mxu0 %v543_v53  ;;  %v1237_v53 = vld [vmem:[%s1625_s7 + $0x38] sm:$0xff]  }
 0x2db   : > { %1134 = vmatprep.subr.bf16.mxu0 %v1322_v8 }
 0x2e1   : > { %1131 = vmatmul.mubr.msk.bf16.vlgmr.msra.gmra.mrb[4].mxu0 %vm393_vm0, %v529_v54  ;;  %v1076_v54 = vld [vmem:[%s1621_s3] ss:$0 sm:$0xff] }
 0x2e2   : > { %1138 = vmatprep.mubr.msk.bf16.mxu0 %vm1323_vm1, %v1322_v8  ;;  %1135 = vmatpush3.bf16.msra.mxu0 %v1224_v60 }
 0x2e3   : > { %1136 = vmatprep.subr.bf16.mxu0 %v1322_v8 }
 0x2e6   : > { %1137 = vmatpush3.bf16.msra.mxu0 %v1225_v61 }
 0x2e7   : > { %1142 = vmatprep.subr.bf16.mxu0 %v1322_v8 }
 0x3b4   : > { %v579_v55 = vpop.f32.mrb[4].mxu0 }
 0x3b5   : > { %v1132_v56 = vpop.f32.mrb[5].mxu0  ;;  %v585_v57 = vsel %vm393_vm0, %v579_v55, -inf }
 0x3b6   : > { %586 = vmax.xlane.f32.xlu1 %v585_v57  ;;  %v582_v58 = vpop.f32.mrb[6].mxu0 }
 0x3b7   : > { %v1133_v59 = vpop.f32.mrb[7].mxu0 }
 0x443   : > { %v587_v62 = vpop.xlane.xlu1 %586 }
 0x444   : > { %v588_v63 = vsub.f32 %v579_v55, %v587_v62 }
 0x446   : > { %v589_v1 = vmul.f32 1.442695, %v588_v63 }
 0x448   : > { %1240 = vpow2.f32 %v589_v1 }
 0x452   : > { %v1241_v2 = vpop.eup %1240 }
 0x453   : > { %v591_v4 = vpack.c.bf16 %v1241_v2, %v1241_v2 }
 0x455   : > { %1139 = vmatmul.mubr.msk.bf16.vlgmr.msra.gmra.mrb[8].mxu0 %vm393_vm0, %v591_v4 }
 0x456   : > { %1143 = vmatpush3.bf16.msra.mxu0 %v658_v3  ;;  %1146 = vmatprep.mubr.msk.bf16.mxu0 %vm1323_vm1, %v1322_v8 }
 0x457   : > { %1144 = vmatprep.subr.bf16.mxu0 %v1322_v8 }
 0x45a   : > { %1145 = vmatpush3.bf16.msra.mxu0 %v660_v5 }
 0x45b   : > { %1158 = vmatprep.subr.bf16.mxu0 %v1322_v8 }
 0x528   : > { %v645_v7 = vpop.f32.mrb[8].mxu0 }
 0x529   : > { %v651_v9 = vmax.f32 %v645_v7, 1e-30  ;;  %v1140_v10 = vpop.f32.mrb[9].mxu0 }
 0x52a   : > { %v648_v11 = vpop.f32.mrb[10].mxu0 }
 0x52b   : > { %1242 = vrcp.f32 %v651_v9  ;;  %v1141_v12 = vpop.f32.mrb[11].mxu0 }
 0x535   : > { %v1243_v13 = vpop.eup %1242 }
 0x536   : > { %v653_v14 = vmul.f32 %v1243_v13, %v1241_v2 }
 0x538   : > { %v654_v15 = vpack.c.bf16 %v653_v14, %v653_v14 }
 0x53a   : > { %1147 = vmatmul.mubr.msk.bf16.vlgmr.msra.gmra.mrb[12].mxu0 %vm393_vm0, %v654_v15 }
 0x53b   : > { %1162 = vmatprep.mubr.msk.bf16.mxu0 %vm1323_vm1, %v1322_v8  ;;  %1159 = vmatpush3.bf16.msra.mxu0 %v1228_v35 }
 0x53c   : > { %1160 = vmatprep.subr.bf16.mxu0 %v1322_v8 }
 0x53f   : > { %1161 = vmatpush3.bf16.msra.mxu0 %v1229_v36 }
 0x60d   : > { %v700_v17 = vpop.f32.mrb[12].mxu0 }
 0x60e   : > { %v706_v18 = vpack.c.bf16 %v700_v17, %v700_v17  ;;  %v1148_v19 = vpop.f32.mrb[13].mxu0 }
 0x60f   : > { %v703_v20 = vpop.f32.mrb[14].mxu0 }
 0x610   : > { %v1149_v21 = vpop.f32.mrb[15].mxu0  ;;  %1155 = vmatmul.mubr.msk.bf16.vlgmr.msra.gmra.mrb[0].mxu1 %vm393_vm0, %v706_v18 }
 0x611   : > { %1182 = vmatprep.mubr.msk.bf16.mxu1 %vm1323_vm1, %v1322_v8 }
 0x6e3   : > { %v764_v23 = vpop.f32.mrb[0].mxu1 }
 0x6e4   : > { %v765_v24 = vadd.f32 %v1070_v22, %v764_v23  ;;  %v1156_v25 = vpop.f32.mrb[1].mxu1 }
 0x6e5   : > { %v767_v26 = vpop.f32.mrb[2].mxu1 }
 0x6e6   : > { %v1557_v27 = vadd.f32 %v765_v24, %v1474_v0  ;;  %v1157_v28 = vpop.f32.mrb[3].mxu1  ;;  %v1230_v0 = vld [vmem:[%s1625_s7] sm:$0xff]  }
 0x6e7   : > { %1167 = vmatpush3.bf16.msra.mxu1 %v1230_v0 }
 0x6e8   : > { %v771_v29 = vsel %vm393_vm0, %v1557_v27, 0.0  ;;  %1168 = vmatprep.subr.bf16.mxu1 %v1322_v8 }
 0x6e9   : > { %772 = vadd.xlane.f32.xlu0 %v771_v29 }
 0x6eb   : > { %1169 = vmatpush3.bf16.msra.mxu1 %v1231_v37 }
 0x6ec   : > { %1170 = vmatprep.subr.bf16.mxu1 %v1322_v8 }
 0x6ef   : > { %1171 = vmatpush3.bf16.msra.mxu1 %v1232_v38 }
 0x6f0   : > { %1172 = vmatprep.subr.bf16.mxu1 %v1322_v8 }
 0x6f3   : > { %1173 = vmatpush3.bf16.msra.mxu1 %v1233_v39 }
 0x6f4   : > { %1174 = vmatprep.subr.bf16.mxu1 %v1322_v8 }
 0x6f7   : > { %1175 = vmatpush3.bf16.msra.mxu1 %v1234_v40 }
 0x6f8   : > { %1176 = vmatprep.subr.bf16.mxu1 %v1322_v8 }
 0x6fb   : > { %1177 = vmatpush3.bf16.msra.mxu1 %v1235_v41 }
 0x6fc   : > { %1178 = vmatprep.subr.bf16.mxu1 %v1322_v8 }
 0x6ff   : > { %1179 = vmatpush3.bf16.msra.mxu1 %v1236_v52 }
 0x700   : > { %1180 = vmatprep.subr.bf16.mxu1 %v1322_v8  ;;  %v1080_v8 = vld [vmem:[%s1619_s1 + $0x5] ss:$0 sm:$0xff] }
 0x703   : > { %1181 = vmatpush3.bf16.msra.mxu1 %v1237_v53 }
 0x776   : > { %v773_v30 = vpop.xlane.xlu0 %772 }
 0x777   : > { %v774_v31 = vmul.f32 0.03125, %v773_v30 }
 0x779   : > { %v775_v32 = vsub.f32 %v1557_v27, %v774_v31 }
 0x77b   : > { %v776_v33 = vmul.f32 %v775_v32, %v775_v32 }
 0x77d   : > { %v777_v34 = vsel %vm393_vm0, %v776_v33, 0.0 }
 0x77e   : > { %778 = vadd.xlane.f32.xlu1 %v777_v34 }
 0x80b   : > { %v779_v42 = vpop.xlane.xlu1 %778 }
 0x80c   : > { %v780_v43 = vmul.f32 0.03125, %v779_v42 }
 0x80e   : > { %v781_v44 = vadd.f32 1e-05, %v780_v43 }
 0x810   : > { %1244 = vrsqrt.f32 %v781_v44 }
 0x81a   : > { %v1245_v45 = vpop.eup %1244 }
 0x81b   : > { %v783_v47 = vmul.f32 %v1245_v45, %v775_v32 }
 0x81d   : > { %v788_v49 = vmul.f32 %v1074_v46, %v783_v47 }
 0x81f   : > { %v793_v50 = vadd.f32 %v1075_v48, %v788_v49 }
 0x821   : > { %v794_v51 = vpack.c.bf16 %v793_v50, %v793_v50 }
 0x823   : > { %1163 = vmatmul.mubr.msk.bf16.vlgmr.msra.gmra.mrb[16].mxu0 %vm393_vm0, %v794_v51 }
 0x8f6   : > { %v855_v55 = vpop.f32.mrb[16].mxu0 }
 0x8f7   : > { %v856_v56 = vadd.f32 %v1076_v54, %v855_v55  ;;  %v1164_v57 = vpop.f32.mrb[17].mxu0 }
 0x8f8   : > { %v858_v58 = vpop.f32.mrb[18].mxu0 }
 0x8f9   : > { %v861_v59 = vmax.f32 %v856_v56, 0.0  ;;  %v1165_v60 = vpop.f32.mrb[19].mxu0 }
 0x8fb   : > { %v862_v61 = vpack.c.bf16 %v861_v59, %v861_v59 }
 0x8fd   : > { %1183 = vmatmul.mubr.bf16.vlgmr.msra.gmra.mrb[4].mxu1 %v862_v61 }
 0x9d0   : > { %v965_v62 = vpop.f32.mrb[4].mxu1 }
 0x9d1   : > { %v966_v63 = vadd.f32 %v1080_v8, %v965_v62  ;;  %v1184_v1 = vpop.f32.mrb[5].mxu1 }
 0x9d2   : > { %v968_v2 = vpop.f32.mrb[6].mxu1 }
 0x9d3   : > { %v971_v3 = vadd.f32 %v966_v63, %v1557_v27  ;;  %v1185_v4 = vpop.f32.mrb[7].mxu1 }
 0x9d5   : > { %972 = vst.msk [vmem:[%s384_s11] sm:$0xff] %vm393_vm0, %v971_v3 }
 0x9d6 PF: > { %s22_s13 = sadd.s32 1, %s1316_s13  }
 0x9d7   : > { %p19_p5 = scmp.ge.s32.totalorder %s22_s13, 4  }
 0x9d9   :  { %21 = sbr.rel (!%p19_p5) target bundleno = 2 (0x2), region = 99 }
 0x9e0   :  { %992 = vsyncpa [#allocation3], 1 }
 0x9e1   :  { %994 = vsyncpa [#allocation3 + $0x1], 1 }
 0x9e2   :  { %995 = vsyncpa [#allocation5], 1 }

</bundles_post_ra>
